<compile_context>
chip_gen: v5e
topology: v5e:2x2
jax: 0.10.0
libtpu: 0.0.40
codegen_flags: <defaults>
</compile_context>

<pallas_src>
import functools

import numpy as np
import jax
import jax.numpy as jnp
from jax.experimental import pallas as pl
from jax.experimental.pallas import tpu as pltpu


def _round_up(x, m):
    return ((x + m - 1) // m) * m


# Keep the double-buffered working set under the tightest scoped-VMEM default
# (16 MiB on v5e; v6e/v7x default to 32 MiB) without having to raise limits.
_VMEM_BUDGET_BYTES = 14 * 1024 * 1024
# Keep the full weight operator VMEM-resident below this size (conservative
# enough for v7x's 64 MiB physical VMEM).
_RESIDENT_W_LIMIT = 4 * 1024 * 1024


@functools.lru_cache(maxsize=32)
def _build_causality_weight(L, K, F, Twp):
    """Dense (L, Twp) operator equivalent to the FFT->analytic->IFFT pipeline.

    Columns [0:T] give K*Re(ifft), columns [T:2T] give -K*Im(ifft), columns
    [2T:Twp] are zero lane-padding (Twp is 128-aligned). Cached so the float64
    host build + host->device transfer happen once per (L, K, F).
    """
    M = 2 * L - 1           # length of the even-symmetric extension
    P = K * M               # IFFT length
    T = K * F               # truncated output length
    f = np.arange(L, dtype=np.float64)
    l = np.arange(L, dtype=np.float64)
    t = np.arange(T, dtype=np.float64)
    # FFT of the symmetric extension: FFT_dx[f] = sum_l B[f, l] * x[l]  (real)
    B = np.where(l[None, :] == 0, 1.0,
                 2.0 * np.cos(2.0 * np.pi * np.outer(f, l) / M))        # (L, L)
    cf = np.where(f == 0, 1.0, 2.0)                                     # (L,)
    ang = 2.0 * np.pi * np.outer(t, f) / P                              # (T, L)
    # output_even = K*Re(ifft), output_odd = -K*Im(ifft); K/P == 1/M.
    Wr = (np.cos(ang) * cf[None, :]) @ B / M                            # (T, L)
    Wi = -(np.sin(ang) * cf[None, :]) @ B / M                           # (T, L)
    Wc = np.zeros((L, Twp), dtype=np.float32)
    Wc[:, :T] = Wr.T
    Wc[:, T:2 * T] = Wi.T
    return jnp.asarray(Wc)


def _budget_ok(tm, tn, L):
    # Double-buffered X tile + W tile + output tile (all f32).
    return 4 * (2 * tm * L + 2 * L * tn + 2 * tm * tn) <= _VMEM_BUDGET_BYTES


def _pick_row_tile(R, tn, L):
    if R < 8:
        return R                      # full-extent row block (8-alignment exception)
    tm = min(512, (R // 8) * 8)       # never exceed the array's row extent
    while tm > 8 and not _budget_ok(tm, tn, L):
        tm = max(8, (tm // 2 // 8) * 8)
    return tm


def _pick_tiles(R, L, Twp):
    """Return (tm, tn, weight_resident) for the (R, L) @ (L, Twp) matmul."""
    if 4 * L * Twp <= _RESIDENT_W_LIMIT:
        tm = _pick_row_tile(R, Twp, L)
        if _budget_ok(tm, Twp, L):
            return tm, Twp, True
    for tn_cap in (512, 256, 128):
        tn = min(tn_cap, Twp)
        tm = _pick_row_tile(R, tn, L)
        if _budget_ok(tm, tn, L):
            return tm, tn, False
    # TODO(synk): extremely large L would also need contraction-axis tiling.
    return _pick_row_tile(R, 128, L), 128, False


def _causality_matmul_kernel(x_ref, w_ref, o_ref):
    # One MXU matmul per tile; f32 accumulation, single lane-dense store.
    o_ref[...] = jnp.dot(
        x_ref[...], w_ref[...],
        preferred_element_type=jnp.float32).astype(o_ref.dtype)


@functools.partial(
    jax.jit, static_argnames=("N", "C", "L", "T", "Twp", "tm", "tn", "resident"))
def _causality_call(X, Wc, *, N, C, L, T, Twp, tm, tn, resident):
    R = N * C
    Tw = 2 * T

    if resident:
        # Weight block index is constant over the 1-D row grid -> W is DMA'd
        # from HBM exactly once and stays VMEM-resident.
        grid = (pl.cdiv(R, tm),)
        in_specs = [
            pl.BlockSpec((tm, L), lambda i: (i, 0)),     # activations
            pl.BlockSpec((L, Twp), lambda i: (0, 0)),    # resident weights
        ]
        out_specs = pl.BlockSpec((tm, Twp), lambda i: (i, 0))
        semantics = ("parallel",)
    else:
        grid = (pl.cdiv(R, tm), pl.cdiv(Twp, tn))
        in_specs = [
            pl.BlockSpec((tm, L), lambda i, j: (i, 0)),
            pl.BlockSpec((L, tn), lambda i, j: (0, j)),
        ]
        out_specs = pl.BlockSpec((tm, tn), lambda i, j: (i, j))
        semantics = ("parallel", "parallel")

    out = pl.pallas_call(
        _causality_matmul_kernel,
        out_shape=jax.ShapeDtypeStruct((R, Twp), jnp.float32),
        grid_spec=pltpu.PrefetchScalarGridSpec(
            num_scalar_prefetch=0,
            grid=grid,
            in_specs=in_specs,
            out_specs=out_specs),
        compiler_params=pltpu.CompilerParams(dimension_semantics=semantics),
    )(X, Wc)

    # Drop lane padding (no-op when 2T is already 128-aligned), then reshape:
    # columns [0:T] are "even" (real) channels, [T:2T] "odd" (-imag) channels,
    # which interleaves exactly like the PyTorch module.
    if Twp != Tw:
        out = out[:, :Tw]
    return out.reshape(N, C, 2, T).reshape(N, 2 * C, T)


def causality_layer(x, K=1, F=None):
    """x: (N, C, L) real.  Returns (N, 2C, K*F) matching CausalityLayer."""
    N, C, L = x.shape
    if F is None:
        F = L // 2
    T = K * F
    Twp = max(128, _round_up(2 * T, 128))      # lane-dense (128-aligned) width

    Wc = _build_causality_weight(L, K, F, Twp)  # (L, Twp) f32, cached/device-resident

    X = x.reshape(N * C, L)
    if X.dtype != jnp.float32:
        X = X.astype(jnp.float32)

    tm, tn, resident = _pick_tiles(N * C, L, Twp)
    out = _causality_call(X, Wc, N=N, C=C, L=L, T=T, Twp=Twp,
                          tm=tm, tn=tn, resident=resident)
    return out.astype(x.dtype)


# ---------------- reference (mirrors the PyTorch module, float64) ------------
def _reference_forward_np(x, K=1, F=None):
    x = np.asarray(x, dtype=np.float64)
    N, C, L = x.shape
    if F is None:
        F = L // 2
    double_x = np.zeros((N, C, 2 * L - 1), dtype=np.float64)
    double_x[..., 0:L] = x
    double_x[..., L:] = x[..., ::-1][..., 0:-1]
    FFT_double_x = np.fft.fft(double_x)
    analytic_x = np.zeros((N, C, K * FFT_double_x.shape[-1]), dtype=np.complex128)
    analytic_x[..., 0] = FFT_double_x[..., 0]
    analytic_x[..., 1:L] = 2 * FFT_double_x[..., 1:L]
    IFFT_analytic = np.fft.ifft(analytic_x)
    trunc = IFFT_analytic[..., 0:K * F]
    out = np.zeros((N, 2 * C, trunc.shape[-1]), dtype=np.float64)
    out[:, 0::2, :] = K * trunc.real
    out[:, 1::2, :] = -K * trunc.imag
    return out


if __name__ == "__main__":
    N, C, L = 2, 4, 16
    K = 1                       # module default

    key = jax.random.PRNGKey(0)
    x = jax.random.normal(key, (N, C, L), dtype=jnp.float32)

    out = causality_layer(x, K=K)
    out = jax.block_until_ready(out)

    ref = _reference_forward_np(np.asarray(x), K=K)
    assert out.shape == (N, 2 * C, K * (L // 2)), out.shape
    assert np.allclose(np.asarray(out), ref, rtol=1e-4, atol=1e-4), \
        float(np.max(np.abs(np.asarray(out) - ref)))

    print("KERNEL_OK")
</pallas_src>

<mosaic_0001>
module attributes {stable_mosaic.version = 11 : i64} {
  func.func @_causality_matmul_kernel(%arg0: i32, %arg1: memref<8x16xf32, #tpu.memory_space<vmem>>, %arg2: memref<16x128xf32, #tpu.memory_space<vmem>>, %arg3: memref<8x128xf32, #tpu.memory_space<vmem>>) attributes {dimension_semantics = [#tpu.dimension_semantics<parallel>], iteration_bounds = array<i64: 1>, scalar_prefetch = 0 : i64, scratch_operands = 0 : i64, tpu.core_type = #tpu.core_type<tc>, window_params = [{transform_indices = @transform_0, window_bounds = array<i64: 8, 16>}, {pipeline_mode = #tpu.pipeline_mode<synchronous>, transform_indices = @transform_1, window_bounds = array<i64: 16, 128>}, {transform_indices = @transform_2, window_bounds = array<i64: 8, 128>}]} {
    %c0 = arith.constant 0 : index
    %c0_0 = arith.constant 0 : index
    %0 = vector.load %arg1[%c0, %c0_0] : memref<8x16xf32, #tpu.memory_space<vmem>>, vector<8x16xf32>
    %c0_1 = arith.constant 0 : index
    %c0_2 = arith.constant 0 : index
    %1 = vector.load %arg2[%c0_1, %c0_2] : memref<16x128xf32, #tpu.memory_space<vmem>>, vector<16x128xf32>
    %cst = arith.constant dense<0.000000e+00> : vector<8x128xf32>
    %2 = tpu.matmul %0, %1, %cst {dimension_numbers = #tpu.dot_dimension_numbers<[1], [0], [0], [1], [0, 0, 1, 1], [], []>} : vector<8x16xf32>, vector<16x128xf32>, vector<8x128xf32> -> vector<8x128xf32>
    %c0_3 = arith.constant 0 : index
    %c0_4 = arith.constant 0 : index
    %3 = vector.load %arg3[%c0_3, %c0_4] : memref<8x128xf32, #tpu.memory_space<vmem>>, vector<8x128xf32>
    tpu.vector_store %arg3[%c0_3, %c0_4], %2 {strides = array<i32>} : memref<8x128xf32, #tpu.memory_space<vmem>>, vector<8x128xf32>,
    return
  }
  func.func @transform_0(%arg0: i32) -> (i32, i32) {
    %c0_i32 = arith.constant 0 : i32
    %c0_i32_0 = arith.constant 0 : i32
    return %arg0, %c0_i32 : i32, i32
  }
  func.func @transform_1(%arg0: i32) -> (i32, i32) {
    %c0_i32 = arith.constant 0 : i32
    %c0_i32_0 = arith.constant 0 : i32
    %c0_i32_1 = arith.constant 0 : i32
    return %c0_i32, %c0_i32_0 : i32, i32
  }
  func.func @transform_2(%arg0: i32) -> (i32, i32) {
    %c0_i32 = arith.constant 0 : i32
    %c0_i32_0 = arith.constant 0 : i32
    return %arg0, %c0_i32 : i32, i32
  }
}

</mosaic_0001>

<bundles_post_ra>
// kernel: _causality_call.1
= control target key start
LH: loop header
LB: loop body
LE: loop exit
PB: predicated region body
PF: predicated region fallthrough
CT: control target
= control target key end

     0   :  { %7 = vsyncpa [#allocation3], 0  ;;  %s160_s0 = inlined_call_operand.hbm [shape: f32[8,16], index: 0, kind: input, shape index: {}]   ;;  %s161_s1 = inlined_call_operand.hbm [shape: f32[16,128], index: 1, kind: input, shape index: {}]   ;;  %s162_s2 = inlined_call_operand.vmem [shape: f32[8,128], index: 2, kind: output, shape index: {}]  }
   0x1   :  { %s14_s11 = sshll.u32 %s160_s0, 4  ;;  %s15_s11 = int_to_ptr.hbm [resolvable:$true] %s14_s11 }
   0x2   :  { %8 = vsyncpa [#allocation5], 0  ;;  %s132_s12 = smov [#allocation2]   ;;  %s24_s16 = sshll.u32 %s161_s1, 4  ;;  %s25_s16 = int_to_ptr.hbm [resolvable:$true] %s24_s16 }
   0x3   :  { %s16_s13 = sshll.u32 %s132_s12, 4  ;;  %s133_s17 = smov [#allocation4]   ;;  %s17_s13 = int_to_ptr.vmem [resolvable:$true] %s16_s13 }
   0x4   :  { %19 = dma.hbm_to_vmem [thread:$0]  %s15_s11, 128, %s17_s13, [#allocation3]  }
   0x5   :  { %s26_s18 = sshll.u32 %s133_s17, 4  ;;  %s134_s19 = smov 128   ;;  %s27_s18 = int_to_ptr.vmem [resolvable:$true] %s26_s18 }
   0x6   :  { %s135_s20 = smov 8  }
   0x7   :  { %32 = dma.hbm_to_vmem [thread:$0]  %s25_s16, 256, %s27_s18, [#allocation5], %s134_s19, %s134_s19, %s135_s20  }
   0x8   :  { %128 = dma.done.wait [#allocation3], 128  }
   0x9   :  { %129 = vsyncadd [#allocation3], 4294967168 }
   0xa   :  { %130 = dma.done.wait [#allocation5], 256  }
   0xb   :  { %131 = vsyncadd [#allocation5], 4294967040  ;;  %v43_v0 = vld [vmem:[#allocation4 + $0x8] sm:$0xff]  ;;  %v42_v1 = vld [vmem:[#allocation4] sm:$0xff]  ;;  %vm44_vm0 = vcmask 130048  }
   0xc   :  { %62 = vmatpush.msra.mxu0 %v43_v0  ;;  %v41_v2 = vld [vmem:[#allocation2] sm:$0xff] }
   0xe   :  { %63 = vmatpush.msra.mxu0 %v42_v1 }
   0xf   :  { %75 = vmatmul.msk.f32.vlgmr.msra.gmra.mxu0 %vm44_vm0, %v41_v2 }
  0x8c   :  { %v65_v3 = vpop.f32.mrf.mxu0 }
  0x8d   :  { %68 = vst [vmem:[%s162_s2] sm:$0xff] %v65_v3 }
  0x8e   :  { %73 = vsyncpa [#allocation3], 1 }
  0x8f   :  { %74 = vsyncpa [#allocation5], 1 }

</bundles_post_ra>
